<compile_context>
chip_gen: v7x
topology: tpu7x:2x2x1
jax: 0.10.0
libtpu: 0.0.40
codegen_flags: <defaults>
</compile_context>

<pallas_src>
import math
from dataclasses import dataclass

import jax
import jax.numpy as jnp
from jax import lax
from jax.experimental import pallas as pl
from jax.experimental.pallas import tpu as pltpu

# container dtype, qmin, qmax (floats used in-kernel before the int cast).
# qint32 upper bound is the largest f32 strictly below 2**31 to keep the cast safe.
QDTYPE_INFO = {
    "qint8": (jnp.int8, -128.0, 127.0),
    "qint16": (jnp.int16, -32768.0, 32767.0),
    "qint32": (jnp.int32, -2147483648.0, 2147483520.0),
}

_SMEM = pl.BlockSpec(memory_space=pltpu.MemorySpace.SMEM)

_VMEM_LIMIT = 32 * 1024 * 1024  # safe on v5e/v6e/v7x (v7x only has 64 MiB physical)

_PARAMS_EW = pltpu.CompilerParams(
    dimension_semantics=("parallel",), vmem_limit_bytes=_VMEM_LIMIT)
_PARAMS_REDUCE_FULL = pltpu.CompilerParams(
    dimension_semantics=("arbitrary",), vmem_limit_bytes=_VMEM_LIMIT)
_PARAMS_REDUCE_AX = pltpu.CompilerParams(
    dimension_semantics=("parallel", "arbitrary"), vmem_limit_bytes=_VMEM_LIMIT)
_PARAMS_MM = pltpu.CompilerParams(
    dimension_semantics=("parallel", "parallel", "arbitrary"),
    vmem_limit_bytes=_VMEM_LIMIT)


# ----------------------------------------------------------------------------
# small helpers
# ----------------------------------------------------------------------------
_INT_MXU_CACHE = None


def _int_mxu_available():
    """True if this chip's MXU natively supports int8 (v4/v5/v6); v7x does not."""
    global _INT_MXU_CACHE
    if _INT_MXU_CACHE is None:
        try:
            d = jax.devices()[0]
            kind = d.device_kind.lower()
            _INT_MXU_CACHE = (d.platform == "tpu"
                              and any(t in kind for t in ("v4", "v5", "v6")))
        except Exception:
            _INT_MXU_CACHE = False
    return _INT_MXU_CACHE


def _round_clip_cast(v_f32, qmin, qmax, dtype):
    # TODO(synk): jnp.round is round-half-to-even; plugin rounding may differ by 1 LSB.
    return jnp.clip(jnp.round(v_f32), qmin, qmax).astype(dtype)


def _lane_dense_2d(shape):
    """Pick a (rows, cols) view with cols a wide multiple of 128, or None."""
    e = math.prod(shape) if len(shape) else 1
    for c in (2048, 1024, 512, 256, 128):
        if e % c == 0:
            return e // c, c
    return None


def _padded_2d_dims(e):
    """(rows, cols, padded_len) for a lane-dense 2-D view of e elements."""
    cols = 2048 if e >= 2048 else 128
    rows = -(-e // cols)
    if rows > 1:
        rows = -(-rows // 8) * 8
    return rows, cols, rows * cols


def _pick_tile(dim, candidates):
    """Largest candidate that evenly divides dim, else the full dim."""
    for c in candidates:
        if dim >= c and dim % c == 0:
            return c
    return dim


def _pick_row_tile(rows, cols, itemsize, max_block_bytes):
    """Row tile with a dtype-aware sublane minimum and a per-block byte cap."""
    min_rt = 32 if itemsize == 1 else (16 if itemsize == 2 else 8)
    cap = max(min_rt, max_block_bytes // max(1, cols * itemsize))
    for c in (4096, 2048, 1024, 512, 256, 128, 64, 32, 16, 8):
        if min_rt <= c <= cap and rows % c == 0:
            return c
    return rows


def _reduce_row_tile(pre, tr, post, itemsize, target=2 << 20):
    cap = max(8, target // max(1, tr * post * itemsize))
    cands = [c for c in (512, 256, 128, 64, 32, 16, 8) if c <= cap]
    return _pick_tile(pre, cands)


def _round_up(v, m):
    return -(-v // m) * m


def _pad2(x, tshape):
    pads = [(0, t - s) for s, t in zip(x.shape, tshape)]
    if any(p[1] for p in pads):
        return jnp.pad(x, pads)
    return x


# ----------------------------------------------------------------------------
# kernels
# ----------------------------------------------------------------------------
def _make_unary_kernel(op, qmin, qmax):
    # identity:        out = round(x*c0 + c1)            (scales fully folded on host)
    # exp/ceil/floor:  out = round(op(x*c0 + c1) * c2)   (nonlinearity in real units)
    def kernel(x_ref, c0_ref, c1_ref, c2_ref, o_ref):
        v = x_ref[...].astype(jnp.float32) * c0_ref[0] + c1_ref[0]
        if op == "exp":
            # TODO(synk): hardware Exp uses a segment LUT; fp exp used here.
            v = jnp.exp(v) * c2_ref[0]
        elif op == "ceil":
            v = jnp.ceil(v) * c2_ref[0]
        elif op == "floor":
            v = jnp.floor(v) * c2_ref[0]
        # "identity" falls through (c2 already folded into c0/c1 on the host)
        o_ref[...] = _round_clip_cast(v, qmin, qmax, o_ref.dtype)

    return kernel


def _make_binary_kernel(op, qmin, qmax):
    # add/sub/max/min: v = op(x*c0, y*c1)   c0 = sx/so, c1 = sy/so
    # mul:             v = (x*y)*c0         c0 = sx*sy/so
    # div:             v = (x/y)*c0         c0 = sx/(sy*so)
    def kernel(x_ref, y_ref, c0_ref, c1_ref, o_ref):
        xf = x_ref[...].astype(jnp.float32)
        yf = y_ref[...].astype(jnp.float32)
        if op == "add":
            v = xf * c0_ref[0] + yf * c1_ref[0]
        elif op == "sub":
            v = xf * c0_ref[0] - yf * c1_ref[0]
        elif op == "mul":
            v = (xf * yf) * c0_ref[0]
        elif op == "div":
            # TODO(synk): hardware Div uses a segment LUT; plain fp divide, no y==0 guard.
            v = (xf / yf) * c0_ref[0]
        elif op == "maximum":
            v = jnp.maximum(xf * c0_ref[0], yf * c1_ref[0])
        elif op == "minimum":
            v = jnp.minimum(xf * c0_ref[0], yf * c1_ref[0])
        else:
            raise ValueError(op)
        o_ref[...] = _round_clip_cast(v, qmin, qmax, o_ref.dtype)

    return kernel


def _make_matmul_kernel(qmin, qmax, dnums, compute_dtype, use_int_mxu):
    def kernel(x_ref, y_ref, c_ref, o_ref, acc_ref):
        @pl.when(pl.program_id(2) == 0)
        def _():
            acc_ref[...] = jnp.zeros_like(acc_ref)

        if use_int_mxu:
            # int8 operands straight to the MXU, exact int32 accumulation.
            acc_ref[...] += lax.dot_general(
                x_ref[...], y_ref[...], dimension_numbers=dnums,
                preferred_element_type=jnp.int32)
        else:
            a = x_ref[...].astype(compute_dtype)
            b = y_ref[...].astype(compute_dtype)
            acc_ref[...] += lax.dot_general(
                a, b, dimension_numbers=dnums,
                preferred_element_type=jnp.float32)

        @pl.when(pl.program_id(2) == pl.num_programs(2) - 1)
        def _():
            o_ref[...] = _round_clip_cast(
                acc_ref[...].astype(jnp.float32) * c_ref[0], qmin, qmax,
                o_ref.dtype)

    return kernel


def _make_reduce_kernel(qmin, qmax, axis):
    # grid = (pre tiles, red tiles); acc_ref holds the f32 partial sums.
    def kernel(x_ref, c_ref, o_ref, acc_ref):
        @pl.when(pl.program_id(1) == 0)
        def _():
            acc_ref[...] = jnp.zeros_like(acc_ref)

        acc_ref[...] += jnp.sum(x_ref[...].astype(jnp.float32), axis=axis)

        @pl.when(pl.program_id(1) == pl.num_programs(1) - 1)
        def _():
            o_ref[...] = _round_clip_cast(
                acc_ref[...] * c_ref[0], qmin, qmax, o_ref.dtype)

    return kernel


def _make_full_reduce_kernel(qmin, qmax):
    def kernel(x_ref, c_ref, o_ref, acc_ref):
        @pl.when(pl.program_id(0) == 0)
        def _():
            acc_ref[...] = jnp.zeros_like(acc_ref)

        acc_ref[...] += jnp.sum(x_ref[...].astype(jnp.float32), keepdims=True)

        @pl.when(pl.program_id(0) == pl.num_programs(0) - 1)
        def _():
            o_ref[...] = _round_clip_cast(
                acc_ref[...] * c_ref[0], qmin, qmax, o_ref.dtype)

    return kernel


def _make_cat_kernel(n, dpost, qmin, qmax):
    def kernel(*refs):
        x_refs = refs[:n]
        c_refs = refs[n:2 * n]
        o_ref = refs[2 * n]
        for i in range(n):
            v = x_refs[i][...].astype(jnp.float32) * c_refs[i][0]
            o_ref[:, i * dpost:(i + 1) * dpost] = _round_clip_cast(
                v, qmin, qmax, o_ref.dtype)

    return kernel


# ----------------------------------------------------------------------------
# pallas_call wrappers
# ----------------------------------------------------------------------------
def _unary_call(op, x_int, c0, c1, c2, out_dtype):
    odt, qmin, qmax = QDTYPE_INFO[out_dtype]
    kernel = _make_unary_kernel(op, qmin, qmax)
    orig_shape = x_int.shape
    e = max(1, math.prod(orig_shape))
    itemsize = x_int.dtype.itemsize
    view = _lane_dense_2d(orig_shape)
    if view is None:
        # Host-pad the flattened array onto the lane-dense tiled path.
        r, c, ep = _padded_2d_dims(e)
        x2 = jnp.pad(x_int.reshape(-1), (0, ep - e)).reshape(r, c)
    else:
        r, c = view
        x2 = x_int.reshape(r, c)
    tr = _pick_row_tile(r, c, itemsize, 2 << 20)
    out = pl.pallas_call(
        kernel,
        out_shape=jax.ShapeDtypeStruct((r, c), odt),
        grid=(r // tr,),
        in_specs=[pl.BlockSpec((tr, c), lambda i: (i, 0)), _SMEM, _SMEM, _SMEM],
        out_specs=pl.BlockSpec((tr, c), lambda i: (i, 0)),
        compiler_params=_PARAMS_EW,
    )(x2, c0, c1, c2)
    if view is None:
        return out.reshape(-1)[:e].reshape(orig_shape)
    return out.reshape(orig_shape)


def _binary_call(op, x_int, y_int, c0, c1, out_dtype):
    odt, qmin, qmax = QDTYPE_INFO[out_dtype]
    kernel = _make_binary_kernel(op, qmin, qmax)
    if x_int.shape != y_int.shape:
        # TODO(synk): broadcast operands are materialized on the host; a tiled
        # broadcast BlockSpec (block 0 on broadcast axes) would avoid this HBM pass.
        bshape = jnp.broadcast_shapes(x_int.shape, y_int.shape)
        x_int = jnp.broadcast_to(x_int, bshape)
        y_int = jnp.broadcast_to(y_int, bshape)
    orig_shape = x_int.shape
    e = max(1, math.prod(orig_shape))
    itemsize = max(x_int.dtype.itemsize, y_int.dtype.itemsize)
    view = _lane_dense_2d(orig_shape)
    if view is None:
        r, c, ep = _padded_2d_dims(e)
        x2 = jnp.pad(x_int.reshape(-1), (0, ep - e)).reshape(r, c)
        y2 = jnp.pad(y_int.reshape(-1), (0, ep - e)).reshape(r, c)
    else:
        r, c = view
        x2 = x_int.reshape(r, c)
        y2 = y_int.reshape(r, c)
    tr = _pick_row_tile(r, c, itemsize, 1 << 20)
    out = pl.pallas_call(
        kernel,
        out_shape=jax.ShapeDtypeStruct((r, c), odt),
        grid=(r // tr,),
        in_specs=[pl.BlockSpec((tr, c), lambda i: (i, 0)),
                  pl.BlockSpec((tr, c), lambda i: (i, 0)),
                  _SMEM, _SMEM],
        out_specs=pl.BlockSpec((tr, c), lambda i: (i, 0)),
        compiler_params=_PARAMS_EW,
    )(x2, y2, c0, c1)
    if view is None:
        return out.reshape(-1)[:e].reshape(orig_shape)
    return out.reshape(orig_shape)


def _matmul_call(x_int, y_int, c, out_dtype, x_trans, y_trans,
                 use_int_mxu, compute_dtype):
    odt, qmin, qmax = QDTYPE_INFO[out_dtype]
    if x_trans:
        K, M = x_int.shape
    else:
        M, K = x_int.shape
    if y_trans:
        N, K2 = y_int.shape
    else:
        K2, N = y_int.shape
    assert K == K2

    # Host-pad to lane / MXU friendly multiples (zero pads contribute 0).
    m_mult = 128 if x_trans else (32 if use_int_mxu else 8)
    Mp = _round_up(M, m_mult)
    Kp = _round_up(K, 128)
    Np = _round_up(N, 128)
    x_p = _pad2(x_int, (Kp, Mp) if x_trans else (Mp, Kp))
    y_p = _pad2(y_int, (Np, Kp) if y_trans else (Kp, Np))

    tm = _pick_tile(Mp, (512, 256, 128, 64, 32, 16, 8))
    tn = _pick_tile(Np, (512, 256, 128))
    tk = _pick_tile(Kp, (512, 256, 128))
    grid = (Mp // tm, Np // tn, Kp // tk)

    x_block = (tk, tm) if x_trans else (tm, tk)
    x_map = (lambda i, j, k: (k, i)) if x_trans else (lambda i, j, k: (i, k))
    y_block = (tn, tk) if y_trans else (tk, tn)
    y_map = (lambda i, j, k: (j, k)) if y_trans else (lambda i, j, k: (k, j))

    lhs_c = 0 if x_trans else 1
    rhs_c = 1 if y_trans else 0
    dnums = (((lhs_c,), (rhs_c,)), ((), ()))
    acc_dtype = jnp.int32 if use_int_mxu else jnp.float32

    kernel = _make_matmul_kernel(qmin, qmax, dnums, compute_dtype, use_int_mxu)
    out = pl.pallas_call(
        kernel,
        out_shape=jax.ShapeDtypeStruct((Mp, Np), odt),
        grid=grid,
        in_specs=[pl.BlockSpec(x_block, x_map),
                  pl.BlockSpec(y_block, y_map),
                  _SMEM],
        out_specs=pl.BlockSpec((tm, tn), lambda i, j, k: (i, j)),
        scratch_shapes=[pltpu.VMEM((tm, tn), acc_dtype)],
        compiler_params=_PARAMS_MM,
    )(x_p, y_p, c)
    if Mp != M or Np != N:
        out = out[:M, :N]
    return out


def _reduce_last_lanedense(x3, c, odt, qmin, qmax):
    """Last-axis sum with a lane-dense (pre/128, 128) output slab.
    x3: (pre//128, 128, red) view of the input."""
    pre128, _, red = x3.shape
    itemsize = x3.dtype.itemsize
    tr = _pick_tile(red, (1024, 512, 256, 128))
    cap = max(1, (2 << 20) // max(1, 128 * tr * itemsize))
    tpa_cands = [t for t in (64, 32, 16, 8) if t <= cap]
    tpa = _pick_tile(pre128, tpa_cands) if tpa_cands else pre128
    out = pl.pallas_call(
        _make_reduce_kernel(qmin, qmax, axis=2),
        out_shape=jax.ShapeDtypeStruct((pre128, 128), odt),
        grid=(pre128 // tpa, red // tr),
        in_specs=[pl.BlockSpec((tpa, 128, tr), lambda i, k: (i, 0, k)), _SMEM],
        out_specs=pl.BlockSpec((tpa, 128), lambda i, k: (i, 0)),
        scratch_shapes=[pltpu.VMEM((tpa, 128), jnp.float32)],
        compiler_params=_PARAMS_REDUCE_AX,
    )(x3, c)
    return out


def _reduce_call(x_int, dim, c, out_dtype):
    """Sum over one axis; input viewed as (pre, red, post); c already folded."""
    odt, qmin, qmax = QDTYPE_INFO[out_dtype]
    shape = x_int.shape
    pre = math.prod(shape[:dim]) if dim > 0 else 1
    red = shape[dim]
    post = math.prod(shape[dim + 1:]) if dim + 1 < len(shape) else 1

    if post == 1 and pre >= 128 and pre % 128 == 0:
        # Lane-dense output slab avoids masked lane-1 stores for last-axis sums.
        try:
            out = _reduce_last_lanedense(
                x_int.reshape(pre // 128, 128, red), c, odt, qmin, qmax)
            out = jax.block_until_ready(out)
            return out.reshape(shape[:dim] + (1,) + shape[dim + 1:])
        except Exception:
            # TODO(synk): lane-relayout of the reduced dim unsupported on this
            # Mosaic version; fall back to the sublane-reduce path below.
            pass

    x3 = x_int.reshape(pre, red, post)
    itemsize = x_int.dtype.itemsize
    tr = _pick_tile(red, (512, 256, 128))
    tp = _reduce_row_tile(pre, tr, post, itemsize)
    out = pl.pallas_call(
        _make_reduce_kernel(qmin, qmax, axis=1),
        out_shape=jax.ShapeDtypeStruct((pre, post), odt),
        grid=(pre // tp, red // tr),
        in_specs=[pl.BlockSpec((tp, tr, post), lambda i, k: (i, k, 0)), _SMEM],
        out_specs=pl.BlockSpec((tp, post), lambda i, k: (i, 0)),
        scratch_shapes=[pltpu.VMEM((tp, post), jnp.float32)],
        compiler_params=_PARAMS_REDUCE_AX,
    )(x3, c)
    return out.reshape(shape[:dim] + (1,) + shape[dim + 1:])


def _full_reduce_call(x_int, c, out_dtype):
    odt, qmin, qmax = QDTYPE_INFO[out_dtype]
    e = max(1, math.prod(x_int.shape))
    view = _lane_dense_2d(x_int.shape)
    if view is None:
        r, cc, ep = _padded_2d_dims(e)
        x2 = jnp.pad(x_int.reshape(-1), (0, ep - e)).reshape(r, cc)
    else:
        r, cc = view
        x2 = x_int.reshape(r, cc)
    itemsize = x_int.dtype.itemsize
    tr = _pick_row_tile(r, cc, itemsize, 4 << 20)
    # TODO(synk): single 'arbitrary' axis serializes onto one TensorCore on v7x;
    # a two-stage parallel partial-sum + tiny combine would use both cores.
    out = pl.pallas_call(
        _make_full_reduce_kernel(qmin, qmax),
        out_shape=jax.ShapeDtypeStruct((1, 1), odt),
        grid=(r // tr,),
        in_specs=[pl.BlockSpec((tr, cc), lambda i: (i, 0)), _SMEM],
        out_specs=pl.BlockSpec((1, 1), lambda i: (0, 0)),
        scratch_shapes=[pltpu.VMEM((1, 1), jnp.float32)],
        compiler_params=_PARAMS_REDUCE_FULL,
    )(x2, c)
    return out.reshape(())


def _cat_requant_flat(xs_int, cs, dim, out_dtype):
    """Fused cat/stack: requantize each (same-shaped) input into its 128-aligned
    slice of one (pre, n*dpost) output.  Returns the flat output, or None if the
    layout is not friendly to the fused path."""
    odt, qmin, qmax = QDTYPE_INFO[out_dtype]
    n = len(xs_int)
    shape = xs_int[0].shape
    pre = math.prod(shape[:dim]) if dim > 0 else 1
    dpost = math.prod(shape[dim:]) if dim < len(shape) else 1
    if dpost % 128 != 0:
        return None  # slices would cross (8,128) tiles -> masked stores
    xs2 = [x.reshape(pre, dpost) for x in xs_int]
    itemsize = xs_int[0].dtype.itemsize
    tp = _pick_row_tile(pre, n * dpost, itemsize, 2 << 20)
    in_specs = ([pl.BlockSpec((tp, dpost), lambda i: (i, 0)) for _ in range(n)]
                + [_SMEM] * n)
    out = pl.pallas_call(
        _make_cat_kernel(n, dpost, qmin, qmax),
        out_shape=jax.ShapeDtypeStruct((pre, n * dpost), odt),
        grid=(pre // tp,),
        in_specs=in_specs,
        out_specs=pl.BlockSpec((tp, n * dpost), lambda i: (i, 0)),
        compiler_params=_PARAMS_EW,
    )(*xs2, *cs)
    return out


# ----------------------------------------------------------------------------
# Minimal QTensor + QFunctional
# ----------------------------------------------------------------------------
@dataclass
class QTensor:
    int_repr: jnp.ndarray  # int8 / int16 / int32 container of quantized values
    scale: jnp.ndarray     # (1,) float32
    dtype: str             # "qint8" | "qint16" | "qint32"


_ZERO = jnp.zeros((1,), jnp.float32)
_ONE = jnp.ones((1,), jnp.float32)


class QFunctional:
    """JAX/Pallas port of horizon_plugin_pytorch FloatFunctional (quantized)."""

    def __init__(self, out_dtype="qint8"):
        self.scale = jnp.ones((1,), jnp.float32)
        self.out_dtype = out_dtype
        self.default_keep_dim = False

    # The torch module's forward is intentionally unusable.
    def forward(self, x):
        raise RuntimeError(
            "FloatFunctional is not intended to use the 'forward'. "
            "Please use the underlying operation")

    def _wrap(self, r):
        return QTensor(r, self.scale, self.out_dtype)

    def _c(self, v):
        return jnp.asarray(v, jnp.float32).reshape(1)

    # -- binary elementwise ----------------------------------------------
    def add(self, x, y):
        if isinstance(y, (int, float)):
            return self._add_scalar(x, y)
        if isinstance(x, (int, float)):
            return self._add_scalar(y, x)
        c0 = self._c(x.scale / self.scale)
        c1 = self._c(y.scale / self.scale)
        return self._wrap(_binary_call("add", x.int_repr, y.int_repr,
                                       c0, c1, self.out_dtype))

    def sub(self, x, y):
        if isinstance(x, (int, float)):
            c0 = self._c(-y.scale / self.scale)
            c1 = self._c(float(x) / self.scale)
            return self._wrap(_unary_call("identity", y.int_repr, c0, c1,
                                          _ONE, self.out_dtype))
        if isinstance(y, (int, float)):
            c0 = self._c(x.scale / self.scale)
            c1 = self._c(-float(y) / self.scale)
            return self._wrap(_unary_call("identity", x.int_repr, c0, c1,
                                          _ONE, self.out_dtype))
        c0 = self._c(x.scale / self.scale)
        c1 = self._c(y.scale / self.scale)
        return self._wrap(_binary_call("sub", x.int_repr, y.int_repr,
                                       c0, c1, self.out_dtype))

    def __rsub__(self, tensor, scalar):
        return self.sub(scalar, tensor)

    def mul(self, x, y):
        if isinstance(y, (int, float)):
            return self._mul_scalar(x, y)
        if isinstance(x, (int, float)):
            return self._mul_scalar(y, x)
        # TODO(synk): qbool operand promotion (torch.bool inputs) not ported.
        c0 = self._c(x.scale * y.scale / self.scale)
        return self._wrap(_binary_call("mul", x.int_repr, y.int_repr,
                                       c0, _ONE, self.out_dtype))

    def div(self, x, y):
        c0 = self._c(x.scale / (y.scale * self.scale))
        return self._wrap(_binary_call("div", x.int_repr, y.int_repr,
                                       c0, _ONE, self.out_dtype))

    def maximum(self, x, y):
        c0 = self._c(x.scale / self.scale)
        c1 = self._c(y.scale / self.scale)
        return self._wrap(_binary_call("maximum", x.int_repr, y.int_repr,
                                       c0, c1, self.out_dtype))

    def minimum(self, x, y):
        c0 = self._c(x.scale / self.scale)
        c1 = self._c(y.scale / self.scale)
        return self._wrap(_binary_call("minimum", x.int_repr, y.int_repr,
                                       c0, c1, self.out_dtype))

    # -- scalar variants ---------------------------------------------------
    def add_scalar(self, x, y):
        return self._add_scalar(x, y)

    def _add_scalar(self, x, y):
        c0 = self._c(x.scale / self.scale)
        c1 = self._c(float(y) / self.scale)
        return self._wrap(_unary_call("identity", x.int_repr, c0, c1,
                                      _ONE, self.out_dtype))

    def mul_scalar(self, x, y):
        return self._mul_scalar(x, y)

    def _mul_scalar(self, x, y):
        odt, _, _ = QDTYPE_INFO[self.out_dtype]
        if y == 0:
            return self._wrap(jnp.zeros(x.int_repr.shape, odt))
        c0 = self._c(x.scale * float(y) / self.scale)
        return self._wrap(_unary_call("identity", x.int_repr, c0, _ZERO,
                                      _ONE, self.out_dtype))

    # -- unary -------------------------------------------------------------
    def exp(self, x):
        c0 = self._c(x.scale)
        c2 = self._c(1.0 / self.scale)
        return self._wrap(_unary_call("exp", x.int_repr, c0, _ZERO, c2,
                                      self.out_dtype))

    def ceil(self, x):
        c0 = self._c(x.scale)
        c2 = self._c(1.0 / self.scale)
        return self._wrap(_unary_call("ceil", x.int_repr, c0, _ZERO, c2,
                                      self.out_dtype))

    def floor(self, x):
        c0 = self._c(x.scale)
        c2 = self._c(1.0 / self.scale)
        return self._wrap(_unary_call("floor", x.int_repr, c0, _ZERO, c2,
                                      self.out_dtype))

    # -- concat / stack (fused requant-into-slices) --------------------------
    def cat(self, xs, dim=0):
        return self._cat(xs, dim)

    concat = cat
    concatenate = cat

    def _cat(self, xs, dim):
        shape = xs[0].int_repr.shape
        dim = dim % len(shape) if len(shape) else 0
        cs = [self._c(qt.scale / self.scale) for qt in xs]
        if all(qt.int_repr.shape == shape for qt in xs):
            flat = _cat_requant_flat([qt.int_repr for qt in xs], cs, dim,
                                     self.out_dtype)
            if flat is not None:
                n = len(xs)
                out_shape = shape[:dim] + (n * shape[dim],) + shape[dim + 1:]
                return self._wrap(flat.reshape(out_shape))
        # TODO(synk): mixed-shape / non-128-aligned concat falls back to
        # per-input requant + XLA concat.
        reqs = [_unary_call("identity", qt.int_repr, c, _ZERO, _ONE,
                            self.out_dtype) for qt, c in zip(xs, cs)]
        return self._wrap(jnp.concatenate(reqs, axis=dim))

    def stack(self, xs, dim=0):
        shape = xs[0].int_repr.shape
        dim = dim % (len(shape) + 1)
        cs = [self._c(qt.scale / self.scale) for qt in xs]
        flat = _cat_requant_flat([qt.int_repr for qt in xs], cs, dim,
                                 self.out_dtype)
        n = len(xs)
        out_shape = shape[:dim] + (n,) + shape[dim:]
        if flat is not None:
            return self._wrap(flat.reshape(out_shape))
        reqs = [_unary_call("identity", qt.int_repr, c, _ZERO, _ONE,
                            self.out_dtype) for qt, c in zip(xs, cs)]
        return self._wrap(jnp.stack(reqs, axis=dim))

    # -- matmul --------------------------------------------------------------
    def matmul(self, x, y, x_trans=False, y_trans=False):
        # TODO(synk): batched (>2-D) matmul not ported; 2-D only.
        both_int8 = (x.dtype == "qint8" and y.dtype == "qint8")
        # Native int8 MXU (exact int32 accumulation) on v4/v5e/v6e; v7x / unknown
        # chips keep the bf16 path, which is exact for qint8 operands.
        # TODO(synk): transposed int8 operands still take the bf16 path.
        use_int_mxu = (both_int8 and not x_trans and not y_trans
                       and _int_mxu_available())
        compute_dtype = jnp.bfloat16 if both_int8 else jnp.float32
        c = self._c(x.scale * y.scale / self.scale)
        r = _matmul_call(x.int_repr, y.int_repr, c, self.out_dtype,
                         x_trans, y_trans, use_int_mxu, compute_dtype)
        return self._wrap(r)

    # -- reductions ----------------------------------------------------------
    def sum(self, x, dim=None, keepdim=False):
        if dim is None:
            c = self._c(x.scale / self.scale)
            return self._wrap(_full_reduce_call(x.int_repr, c, self.out_dtype))
        dim = dim % x.int_repr.ndim
        c = self._c(x.scale / self.scale)
        r = _reduce_call(x.int_repr, dim, c, self.out_dtype)
        if not keepdim:
            r = jnp.squeeze(r, axis=dim)
        return self._wrap(r)

    def mean(self, x, dim=None, keepdim=None):
        if keepdim is None:
            keepdim = self.default_keep_dim
        n_total = math.prod(x.int_repr.shape)
        if dim is None:
            c = self._c(x.scale / (self.scale * float(n_total)))
            return self._wrap(_full_reduce_call(x.int_repr, c, self.out_dtype))
        dim = dim % x.int_repr.ndim
        red = x.int_repr.shape[dim]
        c = self._c(x.scale / (self.scale * float(red)))
        r = _reduce_call(x.int_repr, dim, c, self.out_dtype)
        if not keepdim:
            r = jnp.squeeze(r, axis=dim)
        return self._wrap(r)


# ----------------------------------------------------------------------------
# Demo
# ----------------------------------------------------------------------------
if __name__ == "__main__":
    key = jax.random.PRNGKey(0)
    k1, k2, k3, k4 = jax.random.split(key, 4)

    # qint8 activations stored in int8 containers.
    x_int = jax.random.randint(k1, (2, 4, 16, 16), -128, 128,
                               dtype=jnp.int32).astype(jnp.int8)
    y_int = jax.random.randint(k2, (2, 4, 16, 16), -128, 128,
                               dtype=jnp.int32).astype(jnp.int8)
    x = QTensor(x_int, jnp.full((1,), 0.05, jnp.float32), "qint8")
    y = QTensor(y_int, jnp.full((1,), 0.03, jnp.float32), "qint8")

    qf = QFunctional(out_dtype="qint8")
    qf.scale = jnp.full((1,), 0.1, jnp.float32)

    outs = []
    outs.append(qf.add(x, y).int_repr)
    outs.append(qf.sub(x, y).int_repr)
    outs.append(qf.mul(x, y).int_repr)
    outs.append(qf.div(x, y).int_repr)
    outs.append(qf.maximum(x, y).int_repr)
    outs.append(qf.minimum(x, y).int_repr)
    outs.append(qf.exp(x).int_repr)
    outs.append(qf.ceil(x).int_repr)
    outs.append(qf.floor(x).int_repr)
    outs.append(qf.sum(x, dim=3).int_repr)
    outs.append(qf.sum(x, dim=None).int_repr)
    outs.append(qf.mean(x, dim=2, keepdim=False).int_repr)
    outs.append(qf.cat([x, y], dim=1).int_repr)
    outs.append(qf.stack([x, y], dim=0).int_repr)
    outs.append(qf.add_scalar(x, 1.5).int_repr)
    outs.append(qf.mul_scalar(x, -2.0).int_repr)

    # matmul path (qint32 output; int8 MXU + int32 acc on v4/v5e/v6e, bf16 on v7x)
    a_int = jax.random.randint(k3, (8, 32), -128, 128,
                               dtype=jnp.int32).astype(jnp.int8)
    b_int = jax.random.randint(k4, (32, 16), -128, 128,
                               dtype=jnp.int32).astype(jnp.int8)
    a = QTensor(a_int, jnp.full((1,), 0.02, jnp.float32), "qint8")
    b = QTensor(b_int, jnp.full((1,), 0.04, jnp.float32), "qint8")
    qf_mm = QFunctional(out_dtype="qint32")
    qf_mm.scale = jnp.full((1,), 8e-4, jnp.float32)
    outs.append(qf_mm.matmul(a, b).int_repr)
    outs.append(qf_mm.matmul(a, QTensor(b_int.T, b.scale, b.dtype),
                             y_trans=True).int_repr)

    for o in outs:
        jax.block_until_ready(o)
    print("KERNEL_OK")
</pallas_src>

<mosaic_0001>
module attributes {stable_mosaic.version = 11 : i64} {
  func.func @kernel(%arg0: i32, %arg1: memref<1x2048xi8, #tpu.memory_space<vmem>>, %arg2: memref<1x2048xi8, #tpu.memory_space<vmem>>, %arg3: memref<1xf32, #tpu.memory_space<smem>>, %arg4: memref<1xf32, #tpu.memory_space<smem>>, %arg5: memref<1x2048xi8, #tpu.memory_space<vmem>>) attributes {dimension_semantics = [#tpu.dimension_semantics<parallel>], iteration_bounds = array<i64: 1>, scalar_prefetch = 0 : i64, scratch_operands = 0 : i64, tpu.core_type = #tpu.core_type<tc>, window_params = [{transform_indices = @transform_0, window_bounds = array<i64: 1, 2048>}, {transform_indices = @transform_1, window_bounds = array<i64: 1, 2048>}, {transform_indices = @transform_2, window_bounds = array<i64: 1>}, {transform_indices = @transform_3, window_bounds = array<i64: 1>}, {transform_indices = @transform_4, window_bounds = array<i64: 1, 2048>}]} {
    %c0 = arith.constant 0 : index
    %c0_0 = arith.constant 0 : index
    %0 = vector.load %arg1[%c0, %c0_0] : memref<1x2048xi8, #tpu.memory_space<vmem>>, vector<1x2048xi8>
    %1 = arith.sitofp %0 : vector<1x2048xi8> to vector<1x2048xf32>
    %c0_1 = arith.constant 0 : index
    %c0_2 = arith.constant 0 : index
    %2 = vector.load %arg2[%c0_1, %c0_2] : memref<1x2048xi8, #tpu.memory_space<vmem>>, vector<1x2048xi8>
    %3 = arith.sitofp %2 : vector<1x2048xi8> to vector<1x2048xf32>
    %c0_3 = arith.constant 0 : index
    %4 = memref.load %arg3[%c0_3] : memref<1xf32, #tpu.memory_space<smem>>
    %5 = vector.broadcast %4 : f32 to vector<1x2048xf32>
    %6 = arith.mulf %1, %5 : vector<1x2048xf32>
    %c0_4 = arith.constant 0 : index
    %7 = memref.load %arg4[%c0_4] : memref<1xf32, #tpu.memory_space<smem>>
    %8 = vector.broadcast %7 : f32 to vector<1x2048xf32>
    %9 = arith.mulf %3, %8 : vector<1x2048xf32>
    %10 = arith.addf %6, %9 : vector<1x2048xf32>
    %11 = math.roundeven %10 : vector<1x2048xf32>
    %cst = arith.constant -1.280000e+02 : f32
    %cst_5 = arith.constant 1.270000e+02 : f32
    %12 = vector.broadcast %cst : f32 to vector<1x2048xf32>
    %13 = arith.maximumf %12, %11 : vector<1x2048xf32>
    %14 = vector.broadcast %cst_5 : f32 to vector<1x2048xf32>
    %15 = arith.minimumf %14, %13 : vector<1x2048xf32>
    %16 = arith.fptosi %15 : vector<1x2048xf32> to vector<1x2048xi8>
    %c0_6 = arith.constant 0 : index
    %c0_7 = arith.constant 0 : index
    %17 = vector.load %arg5[%c0_6, %c0_7] : memref<1x2048xi8, #tpu.memory_space<vmem>>, vector<1x2048xi8>
    tpu.vector_store %arg5[%c0_6, %c0_7], %16 {strides = array<i32>} : memref<1x2048xi8, #tpu.memory_space<vmem>>, vector<1x2048xi8>,
    return
  }
  func.func @transform_0(%arg0: i32) -> (i32, i32) {
    %c0_i32 = arith.constant 0 : i32
    %c0_i32_0 = arith.constant 0 : i32
    return %arg0, %c0_i32 : i32, i32
  }
  func.func @transform_1(%arg0: i32) -> (i32, i32) {
    %c0_i32 = arith.constant 0 : i32
    %c0_i32_0 = arith.constant 0 : i32
    return %arg0, %c0_i32 : i32, i32
  }
  func.func @transform_2(%arg0: i32) -> i32 {
    %c0_i32 = arith.constant 0 : i32
    %c0_i32_0 = arith.constant 0 : i32
    return %c0_i32 : i32
  }
  func.func @transform_3(%arg0: i32) -> i32 {
    %c0_i32 = arith.constant 0 : i32
    %c0_i32_0 = arith.constant 0 : i32
    return %c0_i32 : i32
  }
  func.func @transform_4(%arg0: i32) -> (i32, i32) {
    %c0_i32 = arith.constant 0 : i32
    %c0_i32_0 = arith.constant 0 : i32
    return %arg0, %c0_i32 : i32, i32
  }
}

</mosaic_0001>

<bundles_post_ra>
// kernel: tpu_custom_call.1
= control target key start
LH: loop header
LB: loop body
LE: loop exit
PB: predicated region body
PF: predicated region fallthrough
CT: control target
= control target key end

     0   :  { %11 = vsyncpa [#allocation5], 0  ;;  %s794_s0 = inlined_call_operand.hbm [shape: s8[1,2048], index: 0, kind: input, shape index: {}]   ;;  %s795_s1 = inlined_call_operand.hbm [shape: s8[1,2048], index: 1, kind: input, shape index: {}]   ;;  %s796_s2 = inlined_call_operand.<no memory space> [shape: f32[1], index: 2, kind: input, shape index: {}]   ;;  %s797_s3 = inlined_call_operand.<no memory space> [shape: f32[1], index: 3, kind: input, shape index: {}]   ;;  %s798_s4 = inlined_call_operand.hbm [shape: s8[1,2048], index: 4, kind: output, shape index: {}]  }
   0x1   :  { %12 = vsyncpa [#allocation8], 0 }
   0x2   :  { %13 = vsyncpa [#allocation6], 0  ;;  %s575_s15 = smov [#allocation4]   ;;  %s576_s17 = smov [#allocation7]  }
   0x3   :  { %s20_s16 = sshll.u32 %s575_s15, 4  ;;  %s30_s18 = sshll.u32 %s576_s17, 4  ;;  %s21_s16 = int_to_ptr.vmem [resolvable:$true] %s20_s16  ;;  %s31_s18 = int_to_ptr.vmem [resolvable:$true] %s30_s18 }
   0x4   :  { %s503_s21 = scalar_lea.hbm %s794_s0, 256 }
   0x5   :  { %p504_p0 = scmp.ne.s32.totalorder %s794_s0, %s503_s21  ;;  %p507_p1 = scmp.lt.u32.totalorder %s503_s21, %s794_s0 }
   0x7   :  { %p509_p2 = pnand %p507_p1, %p504_p0 }
   0x9   :  { %512 = shalt.err (!%p509_p2)
}
   0xa   :  { %s513_s26 = scalar_lea.vmem %s21_s16, 256  ;;  %p518_p4 = scmp.lt.s32.totalorder %s21_s16, %s21_s16 }
   0xb   :  { %p514_p3 = scmp.ne.s32.totalorder %s21_s16, %s513_s26  ;;  %p519_p5 = scmp.lt.s32.totalorder %s513_s26, %s513_s26 }
   0xd   :  { %p520_p6 = por %p519_p5, %p518_p4 }
   0xf   :  { %p521_p7 = pnand %p520_p6, %p514_p3 }
  0x11   :  { %524 = shalt.err (!%p521_p7)
}
  0x12   :  { %23 = dma.hbm_to_vmem [thread:$0]  %s794_s0, 256, %s21_s16, [#allocation5]  }
  0x13   :  { %s525_s5 = scalar_lea.hbm %s795_s1, 256 }
  0x14   :  { %p526_p8 = scmp.ne.s32.totalorder %s795_s1, %s525_s5  ;;  %p529_p9 = scmp.lt.u32.totalorder %s525_s5, %s795_s1 }
  0x16   :  { %p531_p10 = pnand %p529_p9, %p526_p8 }
  0x18   :  { %534 = shalt.err (!%p531_p10)
}
  0x19   :  { %s535_s10 = scalar_lea.vmem %s31_s18, 256  ;;  %p540_p12 = scmp.lt.s32.totalorder %s31_s18, %s31_s18 }
  0x1a   :  { %p536_p11 = scmp.ne.s32.totalorder %s31_s18, %s535_s10  ;;  %p541_p13 = scmp.lt.s32.totalorder %s535_s10, %s535_s10 }
  0x1c   :  { %p542_p0 = por %p541_p13, %p540_p12 }
  0x1e   :  { %p543_p1 = pnand %p542_p0, %p536_p11 }
  0x20   :  { %546 = shalt.err (!%p543_p1)
}
  0x21   :  { %33 = dma.hbm_to_vmem [thread:$0]  %s795_s1, 256, %s31_s18, [#allocation8]  }
  0x22   :  { %569 = dma.done.wait [#allocation5], 256  }
  0x23   :  { %570 = vsyncadd [#allocation5], 4294967040 }
  0x24   :  { %571 = dma.done.wait [#allocation8], 256  }
  0x25   :  { %572 = vsyncadd [#allocation8], 4294967040  ;;  %v140_v0 = vlaneseq  ;;  %v577_v1 = vmov 1966171168   ;;  %v631_v5 = vstv %s796_s2  ;;  %v636_v6 = vstv %s797_s3  ;;  %v44_v7 = vld [vmem:[#allocation4] sm:$0xff]  ;;  %v62_v8 = vld [vmem:[#allocation7] sm:$0xff] }
  0x26   :  { %v337_v2 = vunpack.c.l.s4 %v577_v1  ;;  %vm430_vm0 = vcmask 1040384   ;;  %vm431_vm1 = vsmask.f32 0  ;;  %vm433_vm2 = vcmask 1041409   ;;  %v45_v29 = vld [vmem:[#allocation4 + $0x8] sm:$0xff]  ;;  %v63_v47 = vld [vmem:[#allocation7 + $0x8] sm:$0xff] }
  0x27   :  { %v141_v3 = vshrl.u32 %v140_v0, 7  ;;  %vm434_vm3 = vsmask.f32 1024  ;;  %vm437_vm4 = vcmask 1042434   ;;  %vm438_vm5 = vsmask.f32 2048  ;;  %vm646_vm8 = vmand %vm430_vm0, %vm431_vm1 }
  0x28   :  { %v338_v4 = vunpack.c.0.s8 %v337_v2  ;;  %v46_v12 = vunpack.c.0.s8 %v44_v7  ;;  %v47_v13 = vunpack.c.1.s8 %v44_v7  ;;  %v48_v14 = vunpack.c.2.s8 %v44_v7  ;;  %vm656_vm9 = vmand %vm433_vm2, %vm434_vm3  ;;  %s578_s1 = smov [#allocation9]  }
  0x29   :  { %v638_v9 = vsub.s32 0, %v141_v3  ;;  %v640_v10 = vsub.s32 4, %v141_v3  ;;  %v49_v15 = vunpack.c.3.s8 %v44_v7  ;;  %v64_v16 = vunpack.c.0.s8 %v62_v8  ;;  %vm436_vm12 = vmor %vm656_vm9, %vm646_vm8  ;;  %s473_s2 = sshll.u32 %s578_s1, 4  ;;  %s474_s2 = int_to_ptr.vmem [resolvable:$true] %s473_s2 }
  0x2a   :  { %v642_v11 = vsub.s32 %v338_v4, %v141_v3  ;;  %v65_v17 = vunpack.c.1.s8 %v62_v8  ;;  %v66_v18 = vunpack.c.2.s8 %v62_v8  ;;  %v67_v19 = vunpack.c.3.s8 %v62_v8  ;;  %vm670_vm13 = vmand %vm437_vm4, %vm438_vm5  ;;  %s547_s3 = scalar_lea.vmem %s474_s2, 256  ;;  %p552_p3 = scmp.lt.s32.totalorder %s474_s2, %s474_s2 }
  0x2b   :  { %vm441_vm6 = vcmask 1043459   ;;  %vm442_vm7 = vsmask.f32 3072  ;;  %v54_v20 = vcvt.s32.f32 %v46_v12  ;;  %v55_v21 = vcvt.s32.f32 %v47_v13  ;;  %vm681_vm0 = vmor %vm670_vm13, %vm436_vm12  ;;  %p548_p2 = scmp.ne.s32.totalorder %s474_s2, %s547_s3  ;;  %p553_p4 = scmp.lt.s32.totalorder %s547_s3, %s547_s3 }
  0x2c   :  { %v56_v22 = vcvt.s32.f32 %v48_v14  ;;  %v57_v23 = vcvt.s32.f32 %v49_v15  ;;  %v72_v24 = vcvt.s32.f32 %v64_v16  ;;  %v73_v25 = vcvt.s32.f32 %v65_v17  ;;  %vm687_vm1 = vmand %vm441_vm6, %vm442_vm7 }
  0x2d   :  { %v74_v26 = vcvt.s32.f32 %v66_v18  ;;  %v75_v27 = vcvt.s32.f32 %v67_v19  ;;  %v82_v30 = vmul.f32 %v631_v5, %v54_v20  ;;  %v83_v31 = vmul.f32 %v631_v5, %v55_v21  ;;  %vm444_vm4 = vmor %vm687_vm1, %vm681_vm0  ;;  %p554_p5 = por %p553_p4, %p552_p3 }
  0x2e   :  { %v84_v32 = vmul.f32 %v631_v5, %v56_v22  ;;  %v85_v33 = vmul.f32 %v631_v5, %v57_v23  ;;  %v92_v35 = vmul.f32 %v636_v6, %v72_v24  ;;  %v93_v36 = vmul.f32 %v636_v6, %v73_v25 }
  0x2f   :  { %v94_v37 = vmul.f32 %v636_v6, %v74_v26  ;;  %v95_v38 = vmul.f32 %v636_v6, %v75_v27  ;;  %vm445_vm10 = vcmask 1044484   ;;  %vm446_vm11 = vsmask.f32 4096  ;;  %p555_p6 = pnand %p554_p5, %p548_p2 }
  0x30   :  { %v50_v39 = vunpack.c.0.s8 %v45_v29  ;;  %v51_v40 = vunpack.c.1.s8 %v45_v29  ;;  %v52_v41 = vunpack.c.2.s8 %v45_v29  ;;  %v53_v42 = vunpack.c.3.s8 %v45_v29  ;;  %vm447_vm5 = vmand %vm445_vm10, %vm446_vm11 }
  0x31   :  { %v100_v43 = vadd.f32 %v92_v35, %v82_v30  ;;  %v101_v44 = vadd.f32 %v93_v36, %v83_v31  ;;  %v102_v45 = vadd.f32 %v94_v37, %v84_v32  ;;  %v103_v46 = vadd.f32 %v95_v38, %v85_v33  ;;  %vm714_vm7 = vmor %vm447_vm5, %vm444_vm4 }
  0x32   :  { %v58_v49 = vcvt.s32.f32 %v50_v39  ;;  %v59_v50 = vcvt.s32.f32 %v51_v40  ;;  %v60_v51 = vcvt.s32.f32 %v52_v41  ;;  %v61_v52 = vcvt.s32.f32 %v53_v42 }
  0x33   :  { %v491_v53 = vround.rtne.f32 %v100_v43  ;;  %v492_v54 = vround.rtne.f32 %v101_v44  ;;  %v493_v55 = vround.rtne.f32 %v102_v45  ;;  %v494_v56 = vround.rtne.f32 %v103_v46 }
  0x34   :  { %vm449_vm14 = vcmask 1045509   ;;  %vm450_vm15 = vsmask.f32 5120  ;;  %v68_v57 = vunpack.c.0.s8 %v63_v47  ;;  %v69_v58 = vunpack.c.1.s8 %v63_v47 }
  0x35   :  { %v70_v59 = vunpack.c.2.s8 %v63_v47  ;;  %v71_v60 = vunpack.c.3.s8 %v63_v47  ;;  %v116_v61 = vmax.f32 %v491_v53, -128.0  ;;  %v117_v62 = vmax.f32 %v492_v54, -128.0  ;;  %vm722_vm8 = vmand %vm449_vm14, %vm450_vm15 }
  0x36   :  { %v118_v63 = vmax.f32 %v493_v55, -128.0  ;;  %v119_v0 = vmax.f32 %v494_v56, -128.0  ;;  %v76_v3 = vcvt.s32.f32 %v68_v57  ;;  %v77_v4 = vcvt.s32.f32 %v69_v58  ;;  %vm452_vm9 = vmor %vm722_vm8, %vm714_vm7 }
  0x37   :  { %v78_v7 = vcvt.s32.f32 %v70_v59  ;;  %v79_v8 = vcvt.s32.f32 %v71_v60  ;;  %v124_v12 = vmin.f32 %v116_v61, 127.0  ;;  %v125_v13 = vmin.f32 %v117_v62, 127.0 }
  0x38   :  { %v126_v14 = vmin.f32 %v118_v63, 127.0  ;;  %v127_v15 = vmin.f32 %v119_v0, 127.0  ;;  %vm453_vm2 = vcmask 1046534   ;;  %vm454_vm3 = vsmask.f32 6144 }
  0x39   :  { %v86_v16 = vmul.f32 %v631_v5, %v58_v49  ;;  %v87_v17 = vmul.f32 %v631_v5, %v59_v50  ;;  %v88_v18 = vmul.f32 %v631_v5, %v60_v51  ;;  %v89_v19 = vmul.f32 %v631_v5, %v61_v52  ;;  %vm455_vm10 = vmand %vm453_vm2, %vm454_vm3 }
  0x3a   :  { %v143_v20 = vrot.slane %v124_v12, %v638_v9  ;;  %v147_v21 = vrot.slane %v124_v12, %v640_v10  ;;  %v151_v22 = vrot.slane %v125_v13, %v638_v9  ;;  %v155_v23 = vrot.slane %v125_v13, %v640_v10  ;;  %vm743_vm12 = vmor %vm455_vm10, %vm452_vm9 }
  0x3b   :  { %v159_v24 = vrot.slane %v126_v14, %v638_v9  ;;  %v163_v25 = vrot.slane %v126_v14, %v640_v10  ;;  %v167_v26 = vrot.slane %v127_v15, %v638_v9  ;;  %v171_v5 = vrot.slane %v127_v15, %v640_v10 }
  0x3c   :  { %v220_v27 = vtrunc.f32 %v143_v20  ;;  %v221_v28 = vtrunc.f32 %v147_v21  ;;  %v222_v29 = vtrunc.f32 %v151_v22  ;;  %v223_v30 = vtrunc.f32 %v155_v23  ;;  %v461_v22 = vld [vmem:[#allocation9] sm:$0xff] }
  0x3d   :  { %vm457_vm6 = vcmask 1047559   ;;  %v224_v31 = vtrunc.f32 %v159_v24  ;;  %v225_v32 = vtrunc.f32 %v163_v25  ;;  %v226_v33 = vtrunc.f32 %v167_v26 }
  0x3e   :  { %v227_v34 = vtrunc.f32 %v171_v5  ;;  %v236_v35 = vpack.c.f32.eXmY %v220_v27, %v220_v27, 312  ;;  %v242_v36 = vpack.c.f32.eXmY %v221_v28, %v221_v28, 312  ;;  %v96_v38 = vmul.f32 %v636_v6, %v76_v3 }
  0x3f   :  { %v97_v39 = vmul.f32 %v636_v6, %v77_v4  ;;  %v248_v40 = vpack.c.f32.eXmY %v222_v29, %v222_v29, 312  ;;  %v254_v41 = vpack.c.f32.eXmY %v223_v30, %v223_v30, 312  ;;  %v98_v43 = vmul.f32 %v636_v6, %v78_v7 }
  0x40   :  { %v99_v44 = vmul.f32 %v636_v6, %v79_v8  ;;  %v260_v45 = vpack.c.f32.eXmY %v224_v31, %v224_v31, 312  ;;  %v266_v46 = vpack.c.f32.eXmY %v225_v32, %v225_v32, 312  ;;  %v483_v47 = vpack.c.b8 %v242_v36, %v236_v35 }
  0x41   :  { %v104_v48 = vadd.f32 %v96_v38, %v86_v16  ;;  %v272_v49 = vpack.c.f32.eXmY %v226_v33, %v226_v33, 312  ;;  %v278_v50 = vpack.c.f32.eXmY %v227_v34, %v227_v34, 312  ;;  %v484_v51 = vpack.c.b8 %v254_v41, %v248_v40 }
  0x42   :  { %v105_v52 = vadd.f32 %v97_v39, %v87_v17  ;;  %v485_v53 = vpack.c.b8 %v266_v46, %v260_v45  ;;  %v342_v54 = vrot.slane %v483_v47, %v642_v11  ;;  %v106_v55 = vadd.f32 %v98_v43, %v88_v18 }
  0x43   :  { %v107_v56 = vadd.f32 %v99_v44, %v89_v19  ;;  %v486_v57 = vpack.c.b8 %v278_v50, %v272_v49  ;;  %v349_v6 = vrot.slane %v484_v51, %v642_v11  ;;  %v495_v58 = vround.rtne.f32 %v104_v48 }
  0x44   :  { %v496_v59 = vround.rtne.f32 %v105_v52  ;;  %v356_v60 = vrot.slane %v485_v53, %v642_v11  ;;  %vm458_vm11 = vsmask.f32 7168  ;;  %v497_v61 = vround.rtne.f32 %v106_v55  ;;  %v464_v55 = vld [vmem:[#allocation9 + $0x8] sm:$0xff] }
  0x45   :  { %v498_v62 = vround.rtne.f32 %v107_v56  ;;  %v363_v63 = vrot.slane %v486_v57, %v642_v11  ;;  %v364_v0 = vcombine.low %v342_v54, %v349_v6  ;;  %v120_v1 = vmax.f32 %v495_v58, -128.0  ;;  %vm749_vm13 = vmand %vm457_vm6, %vm458_vm11 }
  0x46   :  { %v121_v2 = vmax.f32 %v496_v59, -128.0  ;;  %v122_v4 = vmax.f32 %v497_v61, -128.0  ;;  %vm460_vm14 = vmor %vm749_vm13, %vm743_vm12 }
  0x47   :  { %v123_v7 = vmax.f32 %v498_v62, -128.0  ;;  %v365_v8 = vcombine.low %v356_v60, %v363_v63  ;;  %v372_v12 = vrot.slane %v364_v0, %v642_v11  ;;  %v128_v14 = vmin.f32 %v120_v1, 127.0 }
  0x48   :  { %v129_v15 = vmin.f32 %v121_v2, 127.0  ;;  %v130_v16 = vmin.f32 %v122_v4, 127.0 }
  0x49   :  { %v131_v17 = vmin.f32 %v123_v7, 127.0  ;;  %v379_v18 = vrot.slane %v365_v8, %v642_v11  ;;  %v175_v19 = vrot.slane %v128_v14, %v638_v9  ;;  %v179_v20 = vrot.slane %v128_v14, %v640_v10 }
  0x4a   :  { %v183_v21 = vrot.slane %v129_v15, %v638_v9  ;;  %v187_v23 = vrot.slane %v129_v15, %v640_v10  ;;  %v191_v24 = vrot.slane %v130_v16, %v638_v9  ;;  %v195_v25 = vrot.slane %v130_v16, %v640_v10 }
  0x4b   :  { %v199_v26 = vrot.slane %v131_v17, %v638_v9  ;;  %v380_v5 = vcombine.low %v372_v12, %v379_v18  ;;  %v203_v27 = vrot.slane %v131_v17, %v640_v10  ;;  %v228_v28 = vtrunc.f32 %v175_v19 }
  0x4c   :  { %v229_v29 = vtrunc.f32 %v179_v20  ;;  %v230_v30 = vtrunc.f32 %v183_v21  ;;  %v231_v31 = vtrunc.f32 %v187_v23  ;;  %v232_v32 = vtrunc.f32 %v191_v24 }
  0x4d   :  { %v233_v33 = vtrunc.f32 %v195_v25  ;;  %v462_v34 = vsel %vm460_vm14, %v380_v5, %v461_v22  ;;  %v234_v35 = vtrunc.f32 %v199_v26  ;;  %v235_v36 = vtrunc.f32 %v203_v27 }
  0x4e   :  { %v284_v37 = vpack.c.f32.eXmY %v228_v28, %v228_v28, 312  ;;  %463 = vst [vmem:[#allocation9] sm:$0xff] %v462_v34  ;;  %v290_v9 = vpack.c.f32.eXmY %v229_v29, %v229_v29, 312 }
  0x4f   :  { %v296_v38 = vpack.c.f32.eXmY %v230_v30, %v230_v30, 312  ;;  %v302_v39 = vpack.c.f32.eXmY %v231_v31, %v231_v31, 312 }
  0x50   :  { %v308_v10 = vpack.c.f32.eXmY %v232_v32, %v232_v32, 312  ;;  %v314_v40 = vpack.c.f32.eXmY %v233_v33, %v233_v33, 312  ;;  %v487_v42 = vpack.c.b8 %v290_v9, %v284_v37 }
  0x51   :  { %v320_v41 = vpack.c.f32.eXmY %v234_v35, %v234_v35, 312  ;;  %v326_v43 = vpack.c.f32.eXmY %v235_v36, %v235_v36, 312  ;;  %v488_v44 = vpack.c.b8 %v302_v39, %v296_v38 }
  0x52   :  { %v489_v45 = vpack.c.b8 %v314_v40, %v308_v10  ;;  %v391_v46 = vrot.slane %v487_v42, %v642_v11 }
  0x53   :  { %v490_v47 = vpack.c.b8 %v326_v43, %v320_v41  ;;  %v398_v48 = vrot.slane %v488_v44, %v642_v11 }
  0x54   :  { %v405_v49 = vrot.slane %v489_v45, %v642_v11 }
  0x55   :  { %v412_v50 = vrot.slane %v490_v47, %v642_v11  ;;  %v413_v51 = vcombine.low %v391_v46, %v398_v48 }
  0x57   :  { %v414_v52 = vcombine.low %v405_v49, %v412_v50  ;;  %v421_v53 = vrot.slane %v413_v51, %v642_v11 }
  0x59   :  { %v428_v54 = vrot.slane %v414_v52, %v642_v11 }
  0x5b   :  { %v429_v56 = vcombine.low %v421_v53, %v428_v54 }
  0x5d   :  { %v465_v57 = vsel %vm460_vm14, %v429_v56, %v464_v55 }
  0x5e   :  { %466 = vst [vmem:[#allocation9 + $0x8] sm:$0xff] %v465_v57 }
  0x5f   :  { %558 = shalt.err (!%p555_p6)
}
  0x60   :  { %s559_s18 = scalar_lea.hbm %s798_s4, 256 }
  0x61   :  { %p560_p7 = scmp.ne.s32.totalorder %s798_s4, %s559_s18  ;;  %p563_p8 = scmp.lt.u32.totalorder %s559_s18, %s798_s4 }
  0x63   :  { %p565_p9 = pnand %p563_p8, %p560_p7 }
  0x65   :  { %568 = shalt.err (!%p565_p9)
}
  0x66   :  { %476 = dma.vmem_to_hbm [thread:$0]  %s474_s2, 256, %s798_s4, [#allocation6]  }
  0x67   :  { %573 = dma.done.wait [#allocation6], 256  }
  0x68   :  { %574 = vsyncadd [#allocation6], 4294967040 }
  0x69   :  { %480 = vsyncpa [#allocation5], 1 }
  0x6a   :  { %481 = vsyncpa [#allocation8], 1 }
  0x6b   :  { %482 = vsyncpa [#allocation6], 1 }

</bundles_post_ra>
